<compile_context>
chip_gen: v6e
topology: v6e:2x2x1
jax: 0.10.0
libtpu: 0.0.40
codegen_flags: <defaults>
</compile_context>

<pallas_src>
import functools

import jax
import jax.numpy as jnp
from jax import lax
from jax.experimental import pallas as pl
from jax.experimental.pallas import tpu as pltpu

IGNORED_INDEX = -1   # value of `ignored_index` for this module
_LANES = 1024        # 8 full vregs wide (lane-dense)


def _hw_params():
    """(max_block_rows, n_parallel_chunks, vmem_limit_bytes) per TPU gen."""
    try:
        kind = jax.devices()[0].device_kind.lower()
    except Exception:
        kind = ""
    if "v7" in kind:
        # 2 TensorCores; 2048x1024 f32 = 8 MiB per input per buffer ->
        # 2 inputs x 2 buffers = 32 MiB, needs an explicit scoped-VMEM bump.
        return 2048, 2, 40 * 1024 * 1024
    if "v6" in kind:
        # 1024-row blocks (16 MiB double-buffered) fit v6e's 32 MiB default.
        return 1024, 1, None
    # v5e (and conservative default): 512-row blocks fit the 16 MiB default.
    return 512, 1, None


def _masked_mse_kernel(x_ref, t_ref, sum_out_ref, cnt_out_ref, sum_acc, cnt_acc,
                       *, steps_per_chunk, full_blocks, rem_elems):
    """Streams (block_rows, _LANES) tiles; accumulates in vreg-shaped VMEM.

    x_ref, t_ref : (block_rows, _LANES) VMEM input tiles
    sum_out_ref  : (1, 1) SMEM f32 per-chunk squared-diff sum
    cnt_out_ref  : (1, 1) SMEM f32 per-chunk valid-element count
    sum_acc      : (8, _LANES) f32 VMEM partial-sum accumulator
    cnt_acc      : (8, _LANES) f32 VMEM partial-count accumulator

    Static closure params:
      steps_per_chunk : grid extent along axis 1
      full_blocks     : number of logical blocks fully inside the data
      rem_elems       : valid elements in the single boundary block (0 if none)
    """
    i = pl.program_id(0)
    j = pl.program_id(1)

    @pl.when(j == 0)
    def _init():
        sum_acc[...] = jnp.zeros_like(sum_acc)
        cnt_acc[...] = jnp.zeros_like(cnt_acc)

    br, ln = x_ref.shape

    # Cast per-tile inside the kernel (VPU); the wrapper never materializes
    # f32 copies in HBM.
    x = x_ref[...].astype(jnp.float32)
    t = t_ref[...].astype(jnp.float32)
    not_ignored = t != jnp.float32(IGNORED_INDEX)

    def accumulate(valid):
        d = jnp.where(valid, x - t, 0.0)      # where(): no NaN from garbage tails
        m = valid.astype(jnp.float32)         # f32 count: no int chain / overflow
        if br % 8 == 0:
            # Fold rows into groups of 8 sublanes; the leading-axis sum is a
            # chain of plain vreg adds (pure VPU) -- no XLU work in the loop.
            sum_acc[...] += (d * d).reshape(br // 8, 8, ln).sum(axis=0)
            cnt_acc[...] += m.reshape(br // 8, 8, ln).sum(axis=0)
        else:
            # Tiny single-block case (whole problem fits one short block).
            sum_acc[0:1, :] += (d * d).sum(axis=0, keepdims=True)
            cnt_acc[0:1, :] += m.sum(axis=0, keepdims=True)

    # Logical (un-clamped) block index of this grid step.
    logical_block = i * steps_per_chunk + j

    # Fast path: block lies entirely inside the data -> no positional mask.
    @pl.when(logical_block < full_blocks)
    def _full():
        accumulate(not_ignored)

    if rem_elems > 0:
        # Boundary block: mask the ragged tail (partial-block rows contain
        # unspecified data). The bound is a *static* constant, so this is a
        # single iota-compare and it only ever runs on one grid step.
        @pl.when(logical_block == full_blocks)
        def _boundary():
            row = lax.broadcasted_iota(jnp.int32, (br, ln), 0)
            col = lax.broadcasted_iota(jnp.int32, (br, ln), 1)
            accumulate(not_ignored & ((row * ln + col) < rem_elems))

    # logical_block > full_blocks (parallel-axis grid round-up) contributes
    # nothing: accumulators untouched.

    @pl.when(j == pl.num_programs(1) - 1)
    def _finalize():
        # One cross-lane/sublane (XLU) reduce per chunk, outside the hot loop.
        sum_out_ref[0, 0] = jnp.sum(sum_acc[...])
        cnt_out_ref[0, 0] = jnp.sum(cnt_acc[...])


def custom_mse_loss(inp, target):
    """JAX/Pallas equivalent of CustomMSELoss(ignored_index=IGNORED_INDEX)."""
    x = jnp.ravel(inp)
    t = jnp.ravel(target)
    assert x.size == t.size, "input.view(-1, 18) and target must match in size"
    total = int(x.size)

    max_block_rows, n_par, vmem_limit = _hw_params()

    # Lane-dense layout: view the flat arrays as (rows, _LANES). Only the
    # sub-_LANES remainder is ever padded (<= 4 KiB); the ragged final block
    # and the parallel round-up are masked in-kernel instead of padded.
    rem_lane = total % _LANES
    if rem_lane != 0:
        pad = _LANES - rem_lane
        x = jnp.pad(x, (0, pad))
        # IGNORED_INDEX padding is belt-and-braces; the in-kernel positional
        # mask already excludes these elements.
        t = jnp.pad(t, (0, pad), constant_values=IGNORED_INDEX)
    rows = (total + _LANES - 1) // _LANES
    x = x.reshape(rows, _LANES)
    t = t.reshape(rows, _LANES)

    # Static block / grid geometry.
    block_rows = max_block_rows if rows > max_block_rows else rows
    n_blocks = pl.cdiv(rows, block_rows)
    n_par = max(1, min(n_par, n_blocks))
    steps_per_chunk = pl.cdiv(n_blocks, n_par)
    block_elems = block_rows * _LANES
    full_blocks = total // block_elems     # blocks fully inside the data
    rem_elems = total % block_elems        # valid elems in the boundary block

    # Clamp the row-block index so parallel-axis round-up steps never DMA out
    # of range (their contribution is suppressed in-kernel).
    last_block = n_blocks - 1

    def in_idx_map(i, j):
        return (jnp.minimum(i * steps_per_chunk + j, last_block), 0)

    out_idx_map = lambda i, j: (i, 0)

    kernel = functools.partial(
        _masked_mse_kernel,
        steps_per_chunk=steps_per_chunk,
        full_blocks=full_blocks,
        rem_elems=rem_elems,
    )

    compiler_kwargs = dict(dimension_semantics=("parallel", "arbitrary"))
    if vmem_limit is not None:
        compiler_kwargs["vmem_limit_bytes"] = vmem_limit

    # Advisory hint: long, memory-bound custom call.
    bytes_accessed = (int(inp.size) * inp.dtype.itemsize
                      + int(target.size) * target.dtype.itemsize)
    cost = pl.CostEstimate(flops=7 * total, transcendentals=0,
                           bytes_accessed=int(bytes_accessed))

    sums, cnts = pl.pallas_call(
        kernel,
        out_shape=(
            jax.ShapeDtypeStruct((n_par, 1), jnp.float32),
            jax.ShapeDtypeStruct((n_par, 1), jnp.float32),
        ),
        grid_spec=pltpu.PrefetchScalarGridSpec(
            num_scalar_prefetch=0,
            grid=(n_par, steps_per_chunk),
            in_specs=[
                pl.BlockSpec((block_rows, _LANES), in_idx_map),
                pl.BlockSpec((block_rows, _LANES), in_idx_map),
            ],
            out_specs=[
                pl.BlockSpec((1, 1), out_idx_map, memory_space=pltpu.SMEM),
                pl.BlockSpec((1, 1), out_idx_map, memory_space=pltpu.SMEM),
            ],
            scratch_shapes=[
                pltpu.VMEM((8, _LANES), jnp.float32),  # squared-diff partials
                pltpu.VMEM((8, _LANES), jnp.float32),  # valid-count partials
            ],
        ),
        compiler_params=pltpu.CompilerParams(**compiler_kwargs),
        cost_estimate=cost,
    )(x, t)

    # Tiny epilogue: combine per-chunk partials and divide once.
    return jnp.sum(sums) / jnp.sum(cnts)


def _reference_loss(inp, target):
    x = jnp.reshape(inp, (-1, 18)).astype(jnp.float32)
    t = jnp.reshape(target, x.shape).astype(jnp.float32)
    valid = t != jnp.float32(IGNORED_INDEX)
    diff = jnp.where(valid, x - t, 0.0)
    return jnp.sum(diff * diff) / jnp.sum(valid.astype(jnp.float32))


if __name__ == "__main__":
    key = jax.random.PRNGKey(0)
    k1, k2, k3 = jax.random.split(key, 3)

    # Small shapes consistent with the forward: input views to (-1, 18).
    # Use (2, 8, 18) -> viewed as (16, 18); target is (16, 18).
    inp = jax.random.normal(k1, (2, 8, 18), dtype=jnp.float32)
    target = jax.random.normal(k2, (16, 18), dtype=jnp.float32)

    # Sprinkle in some ignored entries (value == IGNORED_INDEX).
    ignore_mask = jax.random.bernoulli(k3, p=0.25, shape=(16, 18))
    target = jnp.where(ignore_mask, jnp.float32(IGNORED_INDEX), target)

    loss = custom_mse_loss(inp, target)
    loss = jax.block_until_ready(loss)

    ref = _reference_loss(inp, target)
    assert jnp.allclose(loss, ref, rtol=1e-5, atol=1e-6), (loss, ref)

    print("KERNEL_OK")
</pallas_src>

<mosaic_0001>
module attributes {stable_mosaic.version = 11 : i64} {
  func.func @_masked_mse_kernel(%arg0: i32, %arg1: i32, %arg2: memref<1x1024xf32, #tpu.memory_space<vmem>>, %arg3: memref<1x1024xf32, #tpu.memory_space<vmem>>, %arg4: memref<1x1xf32, #tpu.memory_space<smem>>, %arg5: memref<1x1xf32, #tpu.memory_space<smem>>, %arg6: memref<8x1024xf32, #tpu.memory_space<vmem>>, %arg7: memref<8x1024xf32, #tpu.memory_space<vmem>>) attributes {dimension_semantics = [#tpu.dimension_semantics<parallel>, #tpu.dimension_semantics<arbitrary>], iteration_bounds = array<i64: 1, 1>, scalar_prefetch = 0 : i64, scratch_operands = 2 : i64, tpu.core_type = #tpu.core_type<tc>, window_params = [{transform_indices = @transform_0, window_bounds = array<i64: 1, 1024>}, {transform_indices = @transform_1, window_bounds = array<i64: 1, 1024>}, {transform_indices = @transform_2, window_bounds = array<i64: 1, 1>}, {transform_indices = @transform_3, window_bounds = array<i64: 1, 1>}]} {
    %c0_i32 = arith.constant 0 : i32
    %0 = arith.cmpi eq, %arg1, %c0_i32 : i32
    %1 = arith.extui %0 : i1 to i32
    %c0_i32_0 = arith.constant 0 : i32
    %2 = arith.cmpi ne, %1, %c0_i32_0 : i32
    scf.if %2 {
      %cst_10 = arith.constant 0.000000e+00 : f32
      %18 = vector.broadcast %cst_10 : f32 to vector<8x1024xf32>
      %c0_11 = arith.constant 0 : index
      %c0_12 = arith.constant 0 : index
      %19 = vector.load %arg6[%c0_11, %c0_12] : memref<8x1024xf32, #tpu.memory_space<vmem>>, vector<8x1024xf32>
      tpu.vector_store %arg6[%c0_11, %c0_12], %18 {strides = array<i32>} : memref<8x1024xf32, #tpu.memory_space<vmem>>, vector<8x1024xf32>,
      %cst_13 = arith.constant 0.000000e+00 : f32
      %20 = vector.broadcast %cst_13 : f32 to vector<8x1024xf32>
      %c0_14 = arith.constant 0 : index
      %c0_15 = arith.constant 0 : index
      %21 = vector.load %arg7[%c0_14, %c0_15] : memref<8x1024xf32, #tpu.memory_space<vmem>>, vector<8x1024xf32>
      tpu.vector_store %arg7[%c0_14, %c0_15], %20 {strides = array<i32>} : memref<8x1024xf32, #tpu.memory_space<vmem>>, vector<8x1024xf32>,
    } else {
    }
    %c0 = arith.constant 0 : index
    %c0_1 = arith.constant 0 : index
    %3 = vector.load %arg2[%c0, %c0_1] : memref<1x1024xf32, #tpu.memory_space<vmem>>, vector<1x1024xf32>
    %c0_2 = arith.constant 0 : index
    %c0_3 = arith.constant 0 : index
    %4 = vector.load %arg3[%c0_2, %c0_3] : memref<1x1024xf32, #tpu.memory_space<vmem>>, vector<1x1024xf32>
    %cst = arith.constant -1.000000e+00 : f32
    %5 = vector.broadcast %cst : f32 to vector<1x1024xf32>
    %6 = arith.cmpf one, %4, %5 : vector<1x1024xf32>
    %c1_i32 = arith.constant 1 : i32
    %7 = arith.muli %arg0, %c1_i32 : i32
    %8 = arith.addi %7, %arg1 : i32
    %c0_i32_4 = arith.constant 0 : i32
    %9 = arith.cmpi slt, %8, %c0_i32_4 : i32
    %10 = arith.extui %9 : i1 to i32
    %c0_i32_5 = arith.constant 0 : i32
    %11 = arith.cmpi ne, %10, %c0_i32_5 : i32
    scf.if %11 {
      %18 = arith.subf %3, %4 : vector<1x1024xf32>
      %cst_10 = arith.constant 0.000000e+00 : f32
      %19 = vector.broadcast %cst_10 : f32 to vector<1x1024xf32>
      %20 = arith.select %6, %18, %19 : vector<1x1024xi1>, vector<1x1024xf32>
      %21 = arith.extui %6 : vector<1x1024xi1> to vector<1x1024xi32>
      %22 = arith.sitofp %21 : vector<1x1024xi32> to vector<1x1024xf32>
      %c0_11 = arith.constant 0 : index
      %c0_12 = arith.constant 0 : index
      %23 = vector.load %arg6[%c0_11, %c0_12] : memref<8x1024xf32, #tpu.memory_space<vmem>>, vector<1x1024xf32>
      %24 = arith.mulf %20, %20 : vector<1x1024xf32>
      %cst_13 = arith.constant dense<0.000000e+00> : vector<1024xf32>
      %25 = vector.multi_reduction <add>, %24, %cst_13 [0] : vector<1x1024xf32> to vector<1024xf32>
      %26 = vector.shape_cast %25 : vector<1024xf32> to vector<1x1024xf32>
      %27 = arith.addf %23, %26 : vector<1x1024xf32>
      %c0_14 = arith.constant 0 : index
      %c0_15 = arith.constant 0 : index
      %28 = vector.load %arg6[%c0_14, %c0_15] : memref<8x1024xf32, #tpu.memory_space<vmem>>, vector<1x1024xf32>
      tpu.vector_store %arg6[%c0_14, %c0_15], %27 {strides = array<i32>} : memref<8x1024xf32, #tpu.memory_space<vmem>>, vector<1x1024xf32>,
      %c0_16 = arith.constant 0 : index
      %c0_17 = arith.constant 0 : index
      %29 = vector.load %arg7[%c0_16, %c0_17] : memref<8x1024xf32, #tpu.memory_space<vmem>>, vector<1x1024xf32>
      %cst_18 = arith.constant dense<0.000000e+00> : vector<1024xf32>
      %30 = vector.multi_reduction <add>, %22, %cst_18 [0] : vector<1x1024xf32> to vector<1024xf32>
      %31 = vector.shape_cast %30 : vector<1024xf32> to vector<1x1024xf32>
      %32 = arith.addf %29, %31 : vector<1x1024xf32>
      %c0_19 = arith.constant 0 : index
      %c0_20 = arith.constant 0 : index
      %33 = vector.load %arg7[%c0_19, %c0_20] : memref<8x1024xf32, #tpu.memory_space<vmem>>, vector<1x1024xf32>
      tpu.vector_store %arg7[%c0_19, %c0_20], %32 {strides = array<i32>} : memref<8x1024xf32, #tpu.memory_space<vmem>>, vector<1x1024xf32>,
    } else {
    }
    %c0_i32_6 = arith.constant 0 : i32
    %12 = arith.cmpi eq, %8, %c0_i32_6 : i32
    %13 = arith.extui %12 : i1 to i32
    %c0_i32_7 = arith.constant 0 : i32
    %14 = arith.cmpi ne, %13, %c0_i32_7 : i32
    scf.if %14 {
      %18 = tpu.iota {dimensions = array<i32: 0>} : vector<1x1024xi32>
      %19 = tpu.iota {dimensions = array<i32: 1>} : vector<1x1024xi32>
      %c1024_i32 = arith.constant 1024 : i32
      %20 = vector.broadcast %c1024_i32 : i32 to vector<1x1024xi32>
      %21 = arith.muli %18, %20 : vector<1x1024xi32>
      %22 = arith.addi %21, %19 : vector<1x1024xi32>
      %c288_i32 = arith.constant 288 : i32
      %23 = vector.broadcast %c288_i32 : i32 to vector<1x1024xi32>
      %24 = arith.cmpi slt, %22, %23 : vector<1x1024xi32>
      %25 = arith.andi %6, %24 : vector<1x1024xi1>
      %26 = arith.subf %3, %4 : vector<1x1024xf32>
      %cst_10 = arith.constant 0.000000e+00 : f32
      %27 = vector.broadcast %cst_10 : f32 to vector<1x1024xf32>
      %28 = arith.select %25, %26, %27 : vector<1x1024xi1>, vector<1x1024xf32>
      %29 = arith.extui %25 : vector<1x1024xi1> to vector<1x1024xi32>
      %30 = arith.sitofp %29 : vector<1x1024xi32> to vector<1x1024xf32>
      %c0_11 = arith.constant 0 : index
      %c0_12 = arith.constant 0 : index
      %31 = vector.load %arg6[%c0_11, %c0_12] : memref<8x1024xf32, #tpu.memory_space<vmem>>, vector<1x1024xf32>
      %32 = arith.mulf %28, %28 : vector<1x1024xf32>
      %cst_13 = arith.constant dense<0.000000e+00> : vector<1024xf32>
      %33 = vector.multi_reduction <add>, %32, %cst_13 [0] : vector<1x1024xf32> to vector<1024xf32>
      %34 = vector.shape_cast %33 : vector<1024xf32> to vector<1x1024xf32>
      %35 = arith.addf %31, %34 : vector<1x1024xf32>
      %c0_14 = arith.constant 0 : index
      %c0_15 = arith.constant 0 : index
      %36 = vector.load %arg6[%c0_14, %c0_15] : memref<8x1024xf32, #tpu.memory_space<vmem>>, vector<1x1024xf32>
      tpu.vector_store %arg6[%c0_14, %c0_15], %35 {strides = array<i32>} : memref<8x1024xf32, #tpu.memory_space<vmem>>, vector<1x1024xf32>,
      %c0_16 = arith.constant 0 : index
      %c0_17 = arith.constant 0 : index
      %37 = vector.load %arg7[%c0_16, %c0_17] : memref<8x1024xf32, #tpu.memory_space<vmem>>, vector<1x1024xf32>
      %cst_18 = arith.constant dense<0.000000e+00> : vector<1024xf32>
      %38 = vector.multi_reduction <add>, %30, %cst_18 [0] : vector<1x1024xf32> to vector<1024xf32>
      %39 = vector.shape_cast %38 : vector<1024xf32> to vector<1x1024xf32>
      %40 = arith.addf %37, %39 : vector<1x1024xf32>
      %c0_19 = arith.constant 0 : index
      %c0_20 = arith.constant 0 : index
      %41 = vector.load %arg7[%c0_19, %c0_20] : memref<8x1024xf32, #tpu.memory_space<vmem>>, vector<1x1024xf32>
      tpu.vector_store %arg7[%c0_19, %c0_20], %40 {strides = array<i32>} : memref<8x1024xf32, #tpu.memory_space<vmem>>, vector<1x1024xf32>,
    } else {
    }
    %c0_i32_8 = arith.constant 0 : i32
    %15 = arith.cmpi eq, %arg1, %c0_i32_8 : i32
    %16 = arith.extui %15 : i1 to i32
    %c0_i32_9 = arith.constant 0 : i32
    %17 = arith.cmpi ne, %16, %c0_i32_9 : i32
    scf.if %17 {
      %c0_10 = arith.constant 0 : index
      %c0_11 = arith.constant 0 : index
      %18 = vector.load %arg6[%c0_10, %c0_11] : memref<8x1024xf32, #tpu.memory_space<vmem>>, vector<8x1024xf32>
      %19 = vector.shape_cast %18 : vector<8x1024xf32> to vector<1x8x1024xf32>
      %cst_12 = arith.constant dense<0.000000e+00> : vector<1xf32>
      %20 = vector.multi_reduction <add>, %19, %cst_12 [1, 2] : vector<1x8x1024xf32> to vector<1xf32>
      %21 = vector.shape_cast %20 : vector<1xf32> to vector<1x1x1xf32>
      %22 = vector.extract %21[0, 0, 0] : f32 from vector<1x1x1xf32>
      %c0_13 = arith.constant 0 : index
      %c0_14 = arith.constant 0 : index
      %23 = memref.load %arg4[%c0_13, %c0_14] : memref<1x1xf32, #tpu.memory_space<smem>>
      memref.store %22, %arg4[%c0_13, %c0_14] : memref<1x1xf32, #tpu.memory_space<smem>>
      %c0_15 = arith.constant 0 : index
      %c0_16 = arith.constant 0 : index
      %24 = vector.load %arg7[%c0_15, %c0_16] : memref<8x1024xf32, #tpu.memory_space<vmem>>, vector<8x1024xf32>
      %25 = vector.shape_cast %24 : vector<8x1024xf32> to vector<1x8x1024xf32>
      %cst_17 = arith.constant dense<0.000000e+00> : vector<1xf32>
      %26 = vector.multi_reduction <add>, %25, %cst_17 [1, 2] : vector<1x8x1024xf32> to vector<1xf32>
      %27 = vector.shape_cast %26 : vector<1xf32> to vector<1x1x1xf32>
      %28 = vector.extract %27[0, 0, 0] : f32 from vector<1x1x1xf32>
      %c0_18 = arith.constant 0 : index
      %c0_19 = arith.constant 0 : index
      %29 = memref.load %arg5[%c0_18, %c0_19] : memref<1x1xf32, #tpu.memory_space<smem>>
      memref.store %28, %arg5[%c0_18, %c0_19] : memref<1x1xf32, #tpu.memory_space<smem>>
    } else {
    }
    return
  }
  func.func @transform_0(%arg0: i32, %arg1: i32) -> (i32, i32) {
    %c1_i32 = arith.constant 1 : i32
    %0 = arith.muli %arg0, %c1_i32 : i32
    %1 = arith.addi %0, %arg1 : i32
    %c0_i32 = arith.constant 0 : i32
    %2 = arith.minsi %1, %c0_i32 : i32
    %c0_i32_0 = arith.constant 0 : i32
    %c0_i32_1 = arith.constant 0 : i32
    return %2, %c0_i32_0 : i32, i32
  }
  func.func @transform_1(%arg0: i32, %arg1: i32) -> (i32, i32) {
    %c1_i32 = arith.constant 1 : i32
    %0 = arith.muli %arg0, %c1_i32 : i32
    %1 = arith.addi %0, %arg1 : i32
    %c0_i32 = arith.constant 0 : i32
    %2 = arith.minsi %1, %c0_i32 : i32
    %c0_i32_0 = arith.constant 0 : i32
    %c0_i32_1 = arith.constant 0 : i32
    return %2, %c0_i32_0 : i32, i32
  }
  func.func @transform_2(%arg0: i32, %arg1: i32) -> (i32, i32) {
    %c0_i32 = arith.constant 0 : i32
    %c0_i32_0 = arith.constant 0 : i32
    return %arg0, %c0_i32 : i32, i32
  }
  func.func @transform_3(%arg0: i32, %arg1: i32) -> (i32, i32) {
    %c0_i32 = arith.constant 0 : i32
    %c0_i32_0 = arith.constant 0 : i32
    return %arg0, %c0_i32 : i32, i32
  }
}

</mosaic_0001>

<bundles_post_ra>
// kernel: tpu_custom_call.1
= control target key start
LH: loop header
LB: loop body
LE: loop exit
PB: predicated region body
PF: predicated region fallthrough
CT: control target
= control target key end

     0   :  { %9 = vsyncpa [#allocation5], 0  ;;  %s433_s0 = inlined_call_operand.hbm [shape: f32[1,1024], index: 0, kind: input, shape index: {}]   ;;  %s434_s1 = inlined_call_operand.hbm [shape: f32[1,1024], index: 1, kind: input, shape index: {}]   ;;  %s435_s2 = inlined_call_operand.hbm [shape: f32[1,1], index: 2, kind: output, shape index: {0}]   ;;  %s436_s3 = inlined_call_operand.hbm [shape: f32[1,1], index: 3, kind: output, shape index: {1}]  }
   0x1   :  { %10 = vsyncpa [#allocation8], 0 }
   0x2   :  { %11 = vsyncpa [#allocation6], 0 }
   0x3   :  { %12 = vsyncpa [#allocation11], 0  ;;  %s377_s12 = smov [#allocation4]   ;;  %s378_s14 = smov [#allocation7]  }
   0x4   :  { %s25_s13 = sshll.u32 %s377_s12, 4  ;;  %s41_s15 = sshll.u32 %s378_s14, 4  ;;  %s26_s13 = int_to_ptr.vmem [resolvable:$true] %s25_s13  ;;  %s42_s15 = int_to_ptr.vmem [resolvable:$true] %s41_s15 }
   0x5   :  { %s321_s16 = scalar_lea.vmem %s26_s13, 128  ;;  %p326_p1 = scmp.lt.s32.totalorder %s26_s13, %s26_s13 }
   0x6   :  { %p322_p0 = scmp.ne.s32.totalorder %s26_s13, %s321_s16  ;;  %p327_p2 = scmp.lt.s32.totalorder %s321_s16, %s321_s16 }
   0x8   :  { %p328_p3 = por %p327_p2, %p326_p1 }
   0xa   :  { %p329_p4 = pnand %p328_p3, %p322_p0 }
   0xc   :  { %332 = shalt.err (!%p329_p4)
}
   0xd   :  { %28 = dma.hbm_to_vmem [thread:$0]  %s433_s0, 128, %s26_s13, [#allocation5]  }
   0xe   :  { %s341_s19 = scalar_lea.vmem %s42_s15, 128  ;;  %p346_p6 = scmp.lt.s32.totalorder %s42_s15, %s42_s15 }
   0xf   :  { %p342_p5 = scmp.ne.s32.totalorder %s42_s15, %s341_s19  ;;  %p347_p7 = scmp.lt.s32.totalorder %s341_s19, %s341_s19 }
  0x11   :  { %p348_p8 = por %p347_p7, %p346_p6 }
  0x13   :  { %p349_p9 = pnand %p348_p8, %p342_p5 }
  0x15   :  { %352 = shalt.err (!%p349_p9)
}
  0x16   :  { %44 = dma.hbm_to_vmem [thread:$0]  %s434_s1, 128, %s42_s15, [#allocation8]  }
  0x17   :  { %369 = dma.done.wait [#allocation5], 128  }
  0x18   :  { %370 = vsyncadd [#allocation5], 4294967168 }
  0x19   :  { %371 = dma.done.wait [#allocation8], 128  }
  0x1a   :  { %372 = vsyncadd [#allocation8], 4294967168  ;;  %v108_v0 = vlaneseq  ;;  %v379_v1 = vmov 0.0   ;;  %v380_v2 = vmov 1966171168   ;;  %v381_v24 = vmov 0  }
  0x1b   :  { %61 = vst [vmem:[#allocation2] sm:$0xff] %v379_v1  ;;  %62 = vst [vmem:[#allocation2 + $0x8] sm:$0xff] %v379_v1  ;;  %v149_v3 = vunpack.c.l.s4 %v380_v2  ;;  %v78_v42 = vld [vmem:[#allocation7] sm:$0xff]  ;;  %v77_v44 = vld [vmem:[#allocation4] sm:$0xff]  ;;  %s382_s1 = smov [#allocation9]   ;;  %s383_s25 = smov [#allocation10]  }
  0x1c   :  { %63 = vst [vmem:[#allocation2 + $0x10] sm:$0xff] %v379_v1  ;;  %64 = vst [vmem:[#allocation2 + $0x18] sm:$0xff] %v379_v1  ;;  %v109_v4 = vshrl.u32 %v108_v0, 7  ;;  %v111_v5 = vand.u32 127, %v108_v0  ;;  %vm79_vm8 = vcmp.ne.f32.partialorder %v78_v42, -1.0  ;;  %v195_v50 = vsub.f32 %v77_v44, %v78_v42 }
  0x1d   :  { %65 = vst [vmem:[#allocation2 + $0x20] sm:$0xff] %v379_v1  ;;  %66 = vst [vmem:[#allocation2 + $0x28] sm:$0xff] %v379_v1  ;;  %v150_v6 = vunpack.c.0.s8 %v149_v3 }
  0x1e   :  { %67 = vst [vmem:[#allocation2 + $0x30] sm:$0xff] %v379_v1  ;;  %68 = vst [vmem:[#allocation2 + $0x38] sm:$0xff] %v379_v1  ;;  %v112_v7 = vadd.s32 128, %v111_v5  ;;  %v113_v8 = vadd.s32 256, %v111_v5  ;;  %v114_v9 = vadd.s32 384, %v111_v5  ;;  %v115_v10 = vadd.s32 512, %v111_v5 }
  0x1f   :  { %69 = vst [vmem:[#allocation3] sm:$0xff] %v379_v1  ;;  %70 = vst [vmem:[#allocation3 + $0x8] sm:$0xff] %v379_v1  ;;  %v116_v11 = vadd.s32 640, %v111_v5  ;;  %v117_v12 = vadd.s32 768, %v111_v5  ;;  %v118_v13 = vadd.s32 896, %v111_v5  ;;  %v119_v14 = vmul.u32 1024, %v109_v4 }
  0x20   :  { %71 = vst [vmem:[#allocation3 + $0x10] sm:$0xff] %v379_v1  ;;  %72 = vst [vmem:[#allocation3 + $0x18] sm:$0xff] %v379_v1  ;;  %v153_v22 = vsub.s32 %v150_v6, %v109_v4 }
  0x21   :  { %73 = vst [vmem:[#allocation3 + $0x20] sm:$0xff] %v379_v1  ;;  %74 = vst [vmem:[#allocation3 + $0x28] sm:$0xff] %v379_v1  ;;  %v120_v15 = vadd.s32 %v119_v14, %v111_v5  ;;  %v121_v16 = vadd.s32 %v119_v14, %v112_v7  ;;  %v122_v17 = vadd.s32 %v119_v14, %v113_v8 }
  0x22   :  { %75 = vst [vmem:[#allocation3 + $0x30] sm:$0xff] %v379_v1  ;;  %76 = vst [vmem:[#allocation3 + $0x38] sm:$0xff] %v379_v1  ;;  %v123_v18 = vadd.s32 %v119_v14, %v114_v9  ;;  %v124_v19 = vadd.s32 %v119_v14, %v115_v10  ;;  %v125_v20 = vadd.s32 %v119_v14, %v116_v11 }
  0x23   :  { %v126_v21 = vadd.s32 %v119_v14, %v117_v12  ;;  %v127_v23 = vadd.s32 %v119_v14, %v118_v13  ;;  %vm128_vm0 = vcmp.lt.s32.totalorder %v120_v15, 288  ;;  %vm129_vm1 = vcmp.lt.s32.totalorder %v121_v16, 288  ;;  %v199_v51 = vld [vmem:[#allocation2] ss:$8 sm:$0xf] }
  0x24   :  { %vm130_vm2 = vcmp.lt.s32.totalorder %v122_v17, 288  ;;  %vm131_vm3 = vcmp.lt.s32.totalorder %v123_v18, 288  ;;  %vm132_vm4 = vcmp.lt.s32.totalorder %v124_v19, 288  ;;  %vm133_vm5 = vcmp.lt.s32.totalorder %v125_v20, 288 }
  0x25   :  { %vm134_vm6 = vcmp.lt.s32.totalorder %v126_v21, 288  ;;  %vm135_vm7 = vcmp.lt.s32.totalorder %v127_v23, 288  ;;  %v136_v25 = vsel %vm128_vm0, 1, %v381_v24  ;;  %v137_v26 = vsel %vm129_vm1, 1, %v381_v24 }
  0x26   :  { %v138_v27 = vsel %vm130_vm2, 1, %v381_v24  ;;  %v139_v28 = vsel %vm131_vm3, 1, %v381_v24  ;;  %v140_v29 = vsel %vm132_vm4, 1, %v381_v24  ;;  %v141_v30 = vsel %vm133_vm5, 1, %v381_v24 }
  0x27   :  { %v142_v31 = vsel %vm134_vm6, 1, %v381_v24  ;;  %v143_v32 = vsel %vm135_vm7, 1, %v381_v24  ;;  %v144_v33 = vcombine.low %v136_v25, %v137_v26  ;;  %v145_v34 = vcombine.low %v138_v27, %v139_v28  ;;  %v207_v47 = vld [vmem:[#allocation3] ss:$8 sm:$0xf] }
  0x28   :  { %v146_v35 = vcombine.low %v140_v29, %v141_v30  ;;  %v147_v36 = vcombine.low %v142_v31, %v143_v32  ;;  %v200_v52 = vld [vmem:[#allocation2] ss:$8 sm:$0xf0] }
  0x29   :  { %v154_v37 = vrot.slane %v144_v33, %v153_v22  ;;  %v161_v38 = vrot.slane %v145_v34, %v153_v22  ;;  %v208_v48 = vld [vmem:[#allocation3] ss:$8 sm:$0xf0]  ;;  %v201_v54 = vor.u32 %v200_v52, %v199_v51 }
  0x2a   :  { %v168_v39 = vrot.slane %v146_v35, %v153_v22  ;;  %v175_v40 = vrot.slane %v147_v36, %v153_v22  ;;  %v209_v53 = vor.u32 %v208_v48, %v207_v47 }
  0x2b   :  { %v176_v41 = vcombine.low %v154_v37, %v161_v38 }
  0x2c   :  { %v177_v43 = vcombine.low %v168_v39, %v175_v40 }
  0x2d   :  { %v184_v45 = vrot.slane %v176_v41, %v153_v22 }
  0x2e   :  { %v191_v46 = vrot.slane %v177_v43, %v153_v22 }
  0x30   :  { %v192_v49 = vcombine.low %v184_v45, %v191_v46 }
  0x32   :  { %vm193_vm9 = vcmp.ne.s32.totalorder %v192_v49, 0 }
  0x33   :  { %vm194_vm10 = vmand %vm79_vm8, %vm193_vm9 }
  0x34   :  { %v196_v55 = vsel %vm194_vm10, %v195_v50, 0.0  ;;  %v301_v56 = vsel %vm194_vm10, 1.0, %v379_v1 }
  0x35   :  { %v202_v57 = vmul.f32 %v196_v55, %v196_v55  ;;  %v211_v58 = vadd.f32 %v301_v56, %v209_v53 }
  0x37   :  { %v204_v59 = vadd.f32 %v202_v57, %v201_v54  ;;  %212 = vst [vmem:[#allocation3] ss:$8 sm:$0xf] %v211_v58  ;;  %213 = vst [vmem:[#allocation3] ss:$8 sm:$0xf0] %v211_v58 }
  0x39   :  { %205 = vst [vmem:[#allocation2] ss:$8 sm:$0xf] %v204_v59  ;;  %206 = vst [vmem:[#allocation2] ss:$8 sm:$0xf0] %v204_v59 }
  0x3e   :  { %v243_v60 = vld [vmem:[#allocation3] sm:$0xff]  ;;  %v244_v61 = vld [vmem:[#allocation3 + $0x8] sm:$0xff]  ;;  %v245_v62 = vld [vmem:[#allocation3 + $0x10] sm:$0xff] }
  0x3f   :  { %v246_v63 = vld [vmem:[#allocation3 + $0x18] sm:$0xff]  ;;  %v251_v0 = vadd.f32 %v244_v61, %v243_v60  ;;  %v247_v8 = vld [vmem:[#allocation3 + $0x20] sm:$0xff]  ;;  %v248_v11 = vld [vmem:[#allocation3 + $0x28] sm:$0xff] }
  0x40   :  { %v217_v2 = vld [vmem:[#allocation2] sm:$0xff]  ;;  %v218_v3 = vld [vmem:[#allocation2 + $0x8] sm:$0xff]  ;;  %v219_v4 = vld [vmem:[#allocation2 + $0x10] sm:$0xff] }
  0x41   :  { %v225_v5 = vadd.f32 %v218_v3, %v217_v2  ;;  %v252_v6 = vadd.f32 %v251_v0, %v245_v62  ;;  %v220_v7 = vld [vmem:[#allocation2 + $0x18] sm:$0xff]  ;;  %v221_v10 = vld [vmem:[#allocation2 + $0x20] sm:$0xff]  ;;  %v222_v14 = vld [vmem:[#allocation2 + $0x28] sm:$0xff] }
  0x42   :  { %v223_v17 = vld [vmem:[#allocation2 + $0x30] sm:$0xff]  ;;  %v224_v20 = vld [vmem:[#allocation2 + $0x38] sm:$0xff] }
  0x43   :  { %v226_v1 = vadd.f32 %v225_v5, %v219_v4  ;;  %v253_v9 = vadd.f32 %v252_v6, %v246_v63  ;;  %v249_v18 = vld [vmem:[#allocation3 + $0x30] sm:$0xff]  ;;  %v250_v23 = vld [vmem:[#allocation3 + $0x38] sm:$0xff] }
  0x45   :  { %v227_v12 = vadd.f32 %v226_v1, %v220_v7  ;;  %v254_v13 = vadd.f32 %v253_v9, %v247_v8 }
  0x47   :  { %v228_v15 = vadd.f32 %v227_v12, %v221_v10  ;;  %v255_v16 = vadd.f32 %v254_v13, %v248_v11 }
  0x49   :  { %v229_v19 = vadd.f32 %v228_v15, %v222_v14  ;;  %v256_v22 = vadd.f32 %v255_v16, %v249_v18 }
  0x4b   :  { %v230_v21 = vadd.f32 %v229_v19, %v223_v17  ;;  %v257_v25 = vadd.f32 %v256_v22, %v250_v23 }
  0x4d   :  { %v231_v24 = vadd.f32 %v230_v21, %v224_v20 }
  0x4f   :  { %232 = vadd.xlane.f32.xlu0 %v231_v24 }
  0x53   :  { %258 = vadd.xlane.f32.xlu0 %v257_v25 }
  0xd8   :  { %v233_v26 = vpop.xlane.xlu0 %232 }
  0xd9   :  { %v234_v27 = vrot.slane %v233_v26, 4 }
  0xdb   :  { %v235_v28 = vadd.f32 %v234_v27, %v233_v26 }
  0xdc   :  { %v259_v29 = vpop.xlane.xlu0 %258 }
  0xdd   :  { %v236_v30 = vrot.slane %v235_v28, 2  ;;  %v260_v31 = vrot.slane %v259_v29, 4 }
  0xdf   :  { %v261_v32 = vadd.f32 %v260_v31, %v259_v29  ;;  %v237_v33 = vadd.f32 %v236_v30, %v235_v28 }
  0xe1   :  { %v262_v34 = vrot.slane %v261_v32, 2  ;;  %v238_v35 = vrot.slane %v237_v33, 1 }
  0xe3   :  { %v263_v36 = vadd.f32 %v262_v34, %v261_v32  ;;  %v239_v37 = vadd.f32 %v238_v35, %v237_v33 }
  0xe5   :  { %302 = vpush %v239_v37  ;;  %v264_v38 = vrot.slane %v263_v36, 1 }
  0xe7   :  { %v265_v39 = vadd.f32 %v264_v38, %v263_v36 }
  0xe9   :  { %304 = vpush %v265_v39 }
 0x116   :  { %s303_s0 = spop %302 }
 0x117   :  { %242 = sst [smem:[#allocation9]] %s303_s0 }
 0x118   :  { %276 = dma.smem_to_hbm %s382_s1, 16, %s435_s2, [#allocation6]  }
 0x11a   :  { %s305_s24 = spop %304 }
 0x11b   :  { %268 = sst [smem:[#allocation10]] %s305_s24 }
 0x11c   :  { %284 = dma.smem_to_hbm %s383_s25, 16, %s436_s3, [#allocation11]  }
 0x11d   :  { %373 = dma.done.wait [#allocation6], 16  }
 0x11e   :  { %374 = vsyncadd [#allocation6], 4294967280 }
 0x11f   :  { %375 = dma.done.wait [#allocation11], 16  }
 0x120   :  { %376 = vsyncadd [#allocation11], 4294967280 }
 0x121   :  { %291 = sfence }
 0x122   :  { %292 = vsyncpa [#allocation5], 1 }
 0x123   :  { %293 = vsyncpa [#allocation8], 1 }
 0x124   :  { %294 = vsyncpa [#allocation6], 1 }
 0x125   :  { %295 = vsyncpa [#allocation11], 1 }

</bundles_post_ra>
